<compile_context>
chip_gen: v6e
topology: v6e:2x2x1
jax: 0.10.0
libtpu: 0.0.40
codegen_flags: <defaults>
</compile_context>

<pallas_src>
import jax
import jax.numpy as jnp
from jax import lax
from jax.experimental import pallas as pl
from jax.experimental.pallas import tpu as pltpu

EPS = 1e-5


def residual_block_kernel(x_ref, w1_ref, w2_ref, g1_ref, b1_ref, g2_ref,
                          b2_ref, out_ref, y_pad_ref):
    N, Hp, WC = x_ref.shape
    H = Hp - 2
    C = g1_ref.shape[1]
    W = WC // C
    M = N * H
    inv_count = 1.0 / float(M * W)          # 1 / (N*H*W) samples per channel
    mxu_dtype = w1_ref.dtype

    # lane <-> channel one-hot routing matrices, generated in-kernel (free VPU
    # work that hides under MXU; saves two input DMAs).
    lane_chan = (lax.broadcasted_iota(jnp.int32, (WC, C), 0) % C ==
                 lax.broadcasted_iota(jnp.int32, (WC, C), 1)
                 ).astype(jnp.float32)                       # (WC, C)
    chan_lane = (lax.broadcasted_iota(jnp.int32, (C, WC), 1) % C ==
                 lax.broadcasted_iota(jnp.int32, (C, WC), 0)
                 ).astype(jnp.float32)                       # (C, WC)

    def conv3(src, w_ref):
        """3x3 conv as ONE matmul with K = 3*WC.

        src: (N, H+2, WC) value already in the MXU dtype.  The three
        row-shifted slabs are concatenated along lanes (K axis) to match the
        (3*WC, WC) stacked banded weight; f32 accumulation on the MXU."""
        rows = jnp.concatenate(
            [src[:, ky:ky + H, :].reshape(M, WC) for ky in range(3)], axis=-1)
        return jnp.dot(rows, w_ref[...], preferred_element_type=jnp.float32)

    def bn_scale_shift(acc, g, b):
        """Fused single-pass BN stats on the live f32 accumulator.

        One (2,WC)x(WC,C) matmul routes [sum; sumsq] to channels; one
        (2,C)x(C,WC) matmul broadcasts [scale; shift] back to lanes.
        NOTE: single-pass variance (E[x^2]-mean^2) is cancellation-prone for
        large-mean activations; fine here, revisit (two-pass) when gridded."""
        stats = jnp.concatenate(
            [jnp.sum(acc, axis=0, keepdims=True),
             jnp.sum(acc * acc, axis=0, keepdims=True)], axis=0)     # (2, WC)
        stats_c = jnp.dot(stats, lane_chan,
                          preferred_element_type=jnp.float32)        # (2, C)
        mean_c = stats_c[0:1] * inv_count
        var_c = stats_c[1:2] * inv_count - mean_c * mean_c           # biased
        scale_c = g * lax.rsqrt(var_c + EPS)                         # EUP slot
        shift_c = b - mean_c * scale_c
        ss = jnp.dot(jnp.concatenate([scale_c, shift_c], axis=0),
                     chan_lane, preferred_element_type=jnp.float32)  # (2, WC)
        return ss[0:1], ss[1:2]

    # ---- load x once; hoist the single operand cast --------------------------
    x_f32 = x_ref[...]                                # (N, H+2, WC), f32
    x_mxu = x_f32.astype(mxu_dtype)

    # ---- conv1 -> bn1 -> relu (epilogue stays f32) ----------------------------
    acc1 = conv3(x_mxu, w1_ref)
    s1, t1 = bn_scale_shift(acc1, g1_ref[...], b1_ref[...])
    y = jnp.maximum(acc1 * s1 + t1, 0.0)

    # ---- stage y once in the MXU dtype; zero ONLY the two halo rows -----------
    y_pad_ref[:, 1:H + 1, :] = y.reshape(N, H, WC).astype(mxu_dtype)
    y_pad_ref[:, 0:1, :] = jnp.zeros((N, 1, WC), mxu_dtype)
    y_pad_ref[:, H + 1:H + 2, :] = jnp.zeros((N, 1, WC), mxu_dtype)

    # ---- conv2 -> bn2 -> +residual -> relu, single lane-dense store -----------
    acc2 = conv3(y_pad_ref[...], w2_ref)
    s2, t2 = bn_scale_shift(acc2, g2_ref[...], b2_ref[...])
    residual = x_f32[:, 1:H + 1, :].reshape(M, WC)
    z = jnp.maximum(acc2 * s2 + t2 + residual, 0.0)
    out_ref[...] = z.reshape(N, H, WC)


def _banded_row_weights(w_oihw, W, dtype):
    """(Cout, Cin, 3, 3) OIHW -> (3*W*Cin, W*Cout) stacked banded matrix.

    B[ky*W*Cin + w_in*Cin + ci, w_out*Cout + co] = w[co, ci, ky, w_in-w_out+1]
    (zero when that kx tap falls outside [0, 2], which also realises the
    zero-padding along W).  Stacking the three ky bands along rows lets each
    conv run as one K = 3*W*Cin matmul."""
    Cout, Cin = w_oihw.shape[0], w_oihw.shape[1]
    wt = jnp.transpose(w_oihw, (2, 3, 1, 0)).astype(jnp.float32)  # (ky,kx,ci,co)
    mats = []
    for ky in range(3):
        B = jnp.zeros((W, Cin, W, Cout), jnp.float32)
        for kx in range(3):
            eye = jnp.eye(W, k=1 - kx, dtype=jnp.float32)  # w_out = w_in + 1 - kx
            B = B + eye[:, None, :, None] * wt[ky, kx][None, :, None, :]
        mats.append(B.reshape(W * Cin, W * Cout))
    return jnp.concatenate(mats, axis=0).astype(dtype)      # (3*W*Cin, W*Cout)


def residual_block(x_nchw, w1, w2, g1, b1, g2, b2, *, mxu_dtype=jnp.bfloat16):
    """x_nchw: (N, C, H, W); w1, w2: (C, C, 3, 3) PyTorch OIHW conv weights.

    mxu_dtype: dtype of the MXU matmul operands (default bf16: native on the
    MXU of every generation, f32 accumulation preserved).  Pass jnp.float32
    for bit-tight results.  BN / ReLU math always stays float32.
    """
    N, C, H, W = x_nchw.shape
    WC = W * C

    # NCHW -> (N, H, W*C); pad one halo row per image along H only (the W
    # padding is folded into the banded weights).  XLA fuses transpose /
    # reshape / pad into a single pass over x.
    x = jnp.transpose(x_nchw, (0, 2, 3, 1)).astype(jnp.float32).reshape(N, H, WC)
    x_pad = jnp.pad(x, ((0, 0), (1, 1), (0, 0)))

    B1 = _banded_row_weights(w1, W, mxu_dtype)               # (3*WC, WC)
    B2 = _banded_row_weights(w2, W, mxu_dtype)

    g1r = g1.reshape(1, C).astype(jnp.float32)
    b1r = b1.reshape(1, C).astype(jnp.float32)
    g2r = g2.reshape(1, C).astype(jnp.float32)
    b2r = b2.reshape(1, C).astype(jnp.float32)

    out = pl.pallas_call(
        residual_block_kernel,
        out_shape=jax.ShapeDtypeStruct((N, H, WC), jnp.float32),
        in_specs=[pl.BlockSpec(memory_space=pltpu.MemorySpace.VMEM)] * 7,
        out_specs=pl.BlockSpec(memory_space=pltpu.MemorySpace.VMEM),
        scratch_shapes=[pltpu.VMEM((N, H + 2, WC), mxu_dtype)],
        compiler_params=pltpu.CompilerParams(
            vmem_limit_bytes=32 * 1024 * 1024),
    )(x_pad, B1, B2, g1r, b1r, g2r, b2r)

    out = out.reshape(N, H, W, C)
    return jnp.transpose(out, (0, 3, 1, 2))                  # back to NCHW


def residual_block_reference(x, w1, w2, g1, b1, g2, b2):
    """Pure-JAX reference (NCHW, matches PyTorch training-mode BN)."""
    def conv(x, w):
        return lax.conv_general_dilated(
            x, w, window_strides=(1, 1), padding=((1, 1), (1, 1)),
            dimension_numbers=('NCHW', 'OIHW', 'NCHW'))

    def bn(x, g, b):
        mean = jnp.mean(x, axis=(0, 2, 3), keepdims=True)
        var = jnp.mean((x - mean) ** 2, axis=(0, 2, 3), keepdims=True)
        return ((x - mean) * lax.rsqrt(var + EPS) * g.reshape(1, -1, 1, 1)
                + b.reshape(1, -1, 1, 1))

    out = jnp.maximum(bn(conv(x, w1), g1, b1), 0.0)
    out = bn(conv(out, w2), g2, b2) + x
    return jnp.maximum(out, 0.0)


if __name__ == "__main__":
    N, C, H, W = 2, 8, 16, 16          # W * C = 128 -> fully lane-dense layout

    key = jax.random.PRNGKey(0)
    k_x, k_w1, k_w2 = jax.random.split(key, 3)

    x = jax.random.normal(k_x, (N, C, H, W), dtype=jnp.float32)
    w1 = jax.random.normal(k_w1, (C, C, 3, 3), dtype=jnp.float32) * 0.1
    w2 = jax.random.normal(k_w2, (C, C, 3, 3), dtype=jnp.float32) * 0.1
    # PyTorch BatchNorm2d default affine init: weight = 1, bias = 0
    g1 = jnp.ones((C,), jnp.float32)
    b1 = jnp.zeros((C,), jnp.float32)
    g2 = jnp.ones((C,), jnp.float32)
    b2 = jnp.zeros((C,), jnp.float32)

    ref = residual_block_reference(x, w1, w2, g1, b1, g2, b2)

    # Default path: bf16 MXU operands, f32 accumulation + f32 epilogue.
    out = jax.block_until_ready(residual_block(x, w1, w2, g1, b1, g2, b2))
    assert out.shape == (N, C, H, W)
    err_bf16 = jnp.max(jnp.abs(out - ref))
    assert jnp.allclose(out, ref, atol=8e-2, rtol=8e-2), \
        f"bf16 path max abs err = {err_bf16}"

    # Bit-tight check of the identical kernel with f32 MXU operands.
    out_f32 = jax.block_until_ready(
        residual_block(x, w1, w2, g1, b1, g2, b2, mxu_dtype=jnp.float32))
    err_f32 = jnp.max(jnp.abs(out_f32 - ref))
    assert jnp.allclose(out_f32, ref, atol=2e-3, rtol=2e-3), \
        f"f32 path max abs err = {err_f32}"

    print("KERNEL_OK")
</pallas_src>

<mosaic_0001>
module attributes {stable_mosaic.version = 11 : i64} {
  func.func @residual_block_kernel(%arg0: memref<2x18x128xf32, #tpu.memory_space<vmem>>, %arg1: memref<384x128xbf16, #tpu.memory_space<vmem>>, %arg2: memref<384x128xbf16, #tpu.memory_space<vmem>>, %arg3: memref<1x8xf32, #tpu.memory_space<vmem>>, %arg4: memref<1x8xf32, #tpu.memory_space<vmem>>, %arg5: memref<1x8xf32, #tpu.memory_space<vmem>>, %arg6: memref<1x8xf32, #tpu.memory_space<vmem>>, %arg7: memref<2x16x128xf32, #tpu.memory_space<vmem>>, %arg8: memref<2x18x128xbf16, #tpu.memory_space<vmem>>) attributes {dimension_semantics = [], scalar_prefetch = 0 : i64, scratch_operands = 1 : i64, tpu.core_type = #tpu.core_type<tc>} {
    %0 = tpu.iota {dimensions = array<i32: 0>} : vector<128x8xi32>
    %c8_i32 = arith.constant 8 : i32
    %c0_i32 = arith.constant 0 : i32
    %1 = arith.cmpi eq, %c8_i32, %c0_i32 : i32
    %c1_i32 = arith.constant 1 : i32
    %2 = arith.select %1, %c1_i32, %c8_i32 : i32
    %3 = vector.broadcast %2 : i32 to vector<128x8xi32>
    %4 = arith.remsi %0, %3 : vector<128x8xi32>
    %c0_i32_0 = arith.constant 0 : i32
    %5 = vector.broadcast %c0_i32_0 : i32 to vector<128x8xi32>
    %6 = arith.cmpi ne, %4, %5 : vector<128x8xi32>
    %c0_i32_1 = arith.constant 0 : i32
    %7 = vector.broadcast %c0_i32_1 : i32 to vector<128x8xi32>
    %8 = arith.cmpi slt, %4, %7 : vector<128x8xi32>
    %c0_i32_2 = arith.constant 0 : i32
    %9 = arith.cmpi slt, %2, %c0_i32_2 : i32
    %10 = vector.broadcast %9 : i1 to vector<128x8xi1>
    %11 = vector.broadcast %10 : vector<128x8xi1> to vector<128x8xi1>
    %12 = arith.xori %8, %11 : vector<128x8xi1>
    %13 = arith.andi %12, %6 : vector<128x8xi1>
    %14 = vector.broadcast %2 : i32 to vector<128x8xi32>
    %15 = arith.addi %4, %14 : vector<128x8xi32>
    %16 = arith.select %13, %15, %4 : vector<128x8xi1>, vector<128x8xi32>
    %17 = tpu.iota {dimensions = array<i32: 1>} : vector<128x8xi32>
    %18 = arith.cmpi eq, %16, %17 : vector<128x8xi32>
    %19 = arith.extui %18 : vector<128x8xi1> to vector<128x8xi32>
    %20 = arith.sitofp %19 : vector<128x8xi32> to vector<128x8xf32>
    %21 = tpu.iota {dimensions = array<i32: 1>} : vector<8x128xi32>
    %c8_i32_3 = arith.constant 8 : i32
    %c0_i32_4 = arith.constant 0 : i32
    %22 = arith.cmpi eq, %c8_i32_3, %c0_i32_4 : i32
    %c1_i32_5 = arith.constant 1 : i32
    %23 = arith.select %22, %c1_i32_5, %c8_i32_3 : i32
    %24 = vector.broadcast %23 : i32 to vector<8x128xi32>
    %25 = arith.remsi %21, %24 : vector<8x128xi32>
    %c0_i32_6 = arith.constant 0 : i32
    %26 = vector.broadcast %c0_i32_6 : i32 to vector<8x128xi32>
    %27 = arith.cmpi ne, %25, %26 : vector<8x128xi32>
    %c0_i32_7 = arith.constant 0 : i32
    %28 = vector.broadcast %c0_i32_7 : i32 to vector<8x128xi32>
    %29 = arith.cmpi slt, %25, %28 : vector<8x128xi32>
    %c0_i32_8 = arith.constant 0 : i32
    %30 = arith.cmpi slt, %23, %c0_i32_8 : i32
    %31 = vector.broadcast %30 : i1 to vector<8x128xi1>
    %32 = vector.broadcast %31 : vector<8x128xi1> to vector<8x128xi1>
    %33 = arith.xori %29, %32 : vector<8x128xi1>
    %34 = arith.andi %33, %27 : vector<8x128xi1>
    %35 = vector.broadcast %23 : i32 to vector<8x128xi32>
    %36 = arith.addi %25, %35 : vector<8x128xi32>
    %37 = arith.select %34, %36, %25 : vector<8x128xi1>, vector<8x128xi32>
    %38 = tpu.iota {dimensions = array<i32: 0>} : vector<8x128xi32>
    %39 = arith.cmpi eq, %37, %38 : vector<8x128xi32>
    %40 = arith.extui %39 : vector<8x128xi1> to vector<8x128xi32>
    %41 = arith.sitofp %40 : vector<8x128xi32> to vector<8x128xf32>
    %c0 = arith.constant 0 : index
    %c0_9 = arith.constant 0 : index
    %c0_10 = arith.constant 0 : index
    %42 = vector.load %arg0[%c0, %c0_9, %c0_10] : memref<2x18x128xf32, #tpu.memory_space<vmem>>, vector<2x18x128xf32>
    %43 = arith.truncf %42 : vector<2x18x128xf32> to vector<2x18x128xbf16>
    %44 = vector.extract_strided_slice %43 {offsets = [0, 0, 0], sizes = [2, 16, 128], strides = [1, 1, 1]} : vector<2x18x128xbf16> to vector<2x16x128xbf16>
    %45 = vector.shape_cast %44 : vector<2x16x128xbf16> to vector<32x128xbf16>
    %46 = vector.extract_strided_slice %43 {offsets = [0, 1, 0], sizes = [2, 16, 128], strides = [1, 1, 1]} : vector<2x18x128xbf16> to vector<2x16x128xbf16>
    %47 = vector.shape_cast %46 : vector<2x16x128xbf16> to vector<32x128xbf16>
    %48 = vector.extract_strided_slice %43 {offsets = [0, 2, 0], sizes = [2, 16, 128], strides = [1, 1, 1]} : vector<2x18x128xbf16> to vector<2x16x128xbf16>
    %49 = vector.shape_cast %48 : vector<2x16x128xbf16> to vector<32x128xbf16>
    %50 = tpu.concatenate %45, %47, %49 in 1 : vector<32x128xbf16>, vector<32x128xbf16>, vector<32x128xbf16> -> vector<32x384xbf16>
    %c0_11 = arith.constant 0 : index
    %c0_12 = arith.constant 0 : index
    %51 = vector.load %arg1[%c0_11, %c0_12] : memref<384x128xbf16, #tpu.memory_space<vmem>>, vector<384x128xbf16>
    %cst = arith.constant dense<0.000000e+00> : vector<32x128xf32>
    %52 = tpu.matmul %50, %51, %cst {dimension_numbers = #tpu.dot_dimension_numbers<[1], [0], [0], [1], [0, 0, 1, 1], [], []>} : vector<32x384xbf16>, vector<384x128xbf16>, vector<32x128xf32> -> vector<32x128xf32>
    %c0_13 = arith.constant 0 : index
    %c0_14 = arith.constant 0 : index
    %53 = vector.load %arg3[%c0_13, %c0_14] : memref<1x8xf32, #tpu.memory_space<vmem>>, vector<1x8xf32>
    %c0_15 = arith.constant 0 : index
    %c0_16 = arith.constant 0 : index
    %54 = vector.load %arg4[%c0_15, %c0_16] : memref<1x8xf32, #tpu.memory_space<vmem>>, vector<1x8xf32>
    %cst_17 = arith.constant dense<0.000000e+00> : vector<128xf32>
    %55 = vector.multi_reduction <add>, %52, %cst_17 [0] : vector<32x128xf32> to vector<128xf32>
    %56 = vector.shape_cast %55 : vector<128xf32> to vector<1x128xf32>
    %57 = arith.mulf %52, %52 : vector<32x128xf32>
    %cst_18 = arith.constant dense<0.000000e+00> : vector<128xf32>
    %58 = vector.multi_reduction <add>, %57, %cst_18 [0] : vector<32x128xf32> to vector<128xf32>
    %59 = vector.shape_cast %58 : vector<128xf32> to vector<1x128xf32>
    %60 = tpu.concatenate %56, %59 in 0 : vector<1x128xf32>, vector<1x128xf32> -> vector<2x128xf32>
    %cst_19 = arith.constant dense<0.000000e+00> : vector<2x8xf32>
    %61 = tpu.matmul %60, %20, %cst_19 {dimension_numbers = #tpu.dot_dimension_numbers<[1], [0], [0], [1], [0, 0, 1, 1], [], []>} : vector<2x128xf32>, vector<128x8xf32>, vector<2x8xf32> -> vector<2x8xf32>
    %62 = vector.extract_strided_slice %61 {offsets = [0, 0], sizes = [1, 8], strides = [1, 1]} : vector<2x8xf32> to vector<1x8xf32>
    %cst_20 = arith.constant 0.001953125 : f32
    %63 = vector.broadcast %cst_20 : f32 to vector<1x8xf32>
    %64 = arith.mulf %62, %63 : vector<1x8xf32>
    %65 = vector.extract_strided_slice %61 {offsets = [1, 0], sizes = [1, 8], strides = [1, 1]} : vector<2x8xf32> to vector<1x8xf32>
    %cst_21 = arith.constant 0.001953125 : f32
    %66 = vector.broadcast %cst_21 : f32 to vector<1x8xf32>
    %67 = arith.mulf %65, %66 : vector<1x8xf32>
    %68 = arith.mulf %64, %64 : vector<1x8xf32>
    %69 = arith.subf %67, %68 : vector<1x8xf32>
    %cst_22 = arith.constant 9.99999974E-6 : f32
    %70 = vector.broadcast %cst_22 : f32 to vector<1x8xf32>
    %71 = arith.addf %69, %70 : vector<1x8xf32>
    %72 = math.rsqrt %71 : vector<1x8xf32>
    %73 = arith.mulf %53, %72 : vector<1x8xf32>
    %74 = arith.mulf %64, %73 : vector<1x8xf32>
    %75 = arith.subf %54, %74 : vector<1x8xf32>
    %76 = tpu.concatenate %73, %75 in 0 : vector<1x8xf32>, vector<1x8xf32> -> vector<2x8xf32>
    %cst_23 = arith.constant dense<0.000000e+00> : vector<2x128xf32>
    %77 = tpu.matmul %76, %41, %cst_23 {dimension_numbers = #tpu.dot_dimension_numbers<[1], [0], [0], [1], [0, 0, 1, 1], [], []>} : vector<2x8xf32>, vector<8x128xf32>, vector<2x128xf32> -> vector<2x128xf32>
    %78 = vector.extract_strided_slice %77 {offsets = [0, 0], sizes = [1, 128], strides = [1, 1]} : vector<2x128xf32> to vector<1x128xf32>
    %79 = vector.extract_strided_slice %77 {offsets = [1, 0], sizes = [1, 128], strides = [1, 1]} : vector<2x128xf32> to vector<1x128xf32>
    %80 = vector.broadcast %78 : vector<1x128xf32> to vector<32x128xf32>
    %81 = arith.mulf %52, %80 : vector<32x128xf32>
    %82 = vector.broadcast %79 : vector<1x128xf32> to vector<32x128xf32>
    %83 = arith.addf %81, %82 : vector<32x128xf32>
    %cst_24 = arith.constant 0.000000e+00 : f32
    %84 = vector.broadcast %cst_24 : f32 to vector<32x128xf32>
    %85 = arith.maximumf %83, %84 : vector<32x128xf32>
    %86 = vector.shape_cast %85 : vector<32x128xf32> to vector<2x16x128xf32>
    %87 = arith.truncf %86 : vector<2x16x128xf32> to vector<2x16x128xbf16>
    %c0_25 = arith.constant 0 : index
    %c1 = arith.constant 1 : index
    %c0_26 = arith.constant 0 : index
    %88 = vector.load %arg8[%c0_25, %c1, %c0_26] : memref<2x18x128xbf16, #tpu.memory_space<vmem>>, vector<2x16x128xbf16>
    tpu.vector_store %arg8[%c0_25, %c1, %c0_26], %87 {strides = array<i32>} : memref<2x18x128xbf16, #tpu.memory_space<vmem>>, vector<2x16x128xbf16>,
    %cst_27 = arith.constant 0.000000e+00 : bf16
    %89 = vector.broadcast %cst_27 : bf16 to vector<2x1x128xbf16>
    %c0_28 = arith.constant 0 : index
    %c0_29 = arith.constant 0 : index
    %c0_30 = arith.constant 0 : index
    %90 = vector.load %arg8[%c0_28, %c0_29, %c0_30] : memref<2x18x128xbf16, #tpu.memory_space<vmem>>, vector<2x1x128xbf16>
    tpu.vector_store %arg8[%c0_28, %c0_29, %c0_30], %89 {strides = array<i32>} : memref<2x18x128xbf16, #tpu.memory_space<vmem>>, vector<2x1x128xbf16>,
    %cst_31 = arith.constant 0.000000e+00 : bf16
    %91 = vector.broadcast %cst_31 : bf16 to vector<2x1x128xbf16>
    %c0_32 = arith.constant 0 : index
    %c17 = arith.constant 17 : index
    %c0_33 = arith.constant 0 : index
    %92 = vector.load %arg8[%c0_32, %c17, %c0_33] : memref<2x18x128xbf16, #tpu.memory_space<vmem>>, vector<2x1x128xbf16>
    tpu.vector_store %arg8[%c0_32, %c17, %c0_33], %91 {strides = array<i32>} : memref<2x18x128xbf16, #tpu.memory_space<vmem>>, vector<2x1x128xbf16>,
    %c0_34 = arith.constant 0 : index
    %c0_35 = arith.constant 0 : index
    %c0_36 = arith.constant 0 : index
    %93 = vector.load %arg8[%c0_34, %c0_35, %c0_36] : memref<2x18x128xbf16, #tpu.memory_space<vmem>>, vector<2x18x128xbf16>
    %94 = vector.extract_strided_slice %93 {offsets = [0, 0, 0], sizes = [2, 16, 128], strides = [1, 1, 1]} : vector<2x18x128xbf16> to vector<2x16x128xbf16>
    %95 = vector.shape_cast %94 : vector<2x16x128xbf16> to vector<32x128xbf16>
    %96 = vector.extract_strided_slice %93 {offsets = [0, 1, 0], sizes = [2, 16, 128], strides = [1, 1, 1]} : vector<2x18x128xbf16> to vector<2x16x128xbf16>
    %97 = vector.shape_cast %96 : vector<2x16x128xbf16> to vector<32x128xbf16>
    %98 = vector.extract_strided_slice %93 {offsets = [0, 2, 0], sizes = [2, 16, 128], strides = [1, 1, 1]} : vector<2x18x128xbf16> to vector<2x16x128xbf16>
    %99 = vector.shape_cast %98 : vector<2x16x128xbf16> to vector<32x128xbf16>
    %100 = tpu.concatenate %95, %97, %99 in 1 : vector<32x128xbf16>, vector<32x128xbf16>, vector<32x128xbf16> -> vector<32x384xbf16>
    %c0_37 = arith.constant 0 : index
    %c0_38 = arith.constant 0 : index
    %101 = vector.load %arg2[%c0_37, %c0_38] : memref<384x128xbf16, #tpu.memory_space<vmem>>, vector<384x128xbf16>
    %cst_39 = arith.constant dense<0.000000e+00> : vector<32x128xf32>
    %102 = tpu.matmul %100, %101, %cst_39 {dimension_numbers = #tpu.dot_dimension_numbers<[1], [0], [0], [1], [0, 0, 1, 1], [], []>} : vector<32x384xbf16>, vector<384x128xbf16>, vector<32x128xf32> -> vector<32x128xf32>
    %c0_40 = arith.constant 0 : index
    %c0_41 = arith.constant 0 : index
    %103 = vector.load %arg5[%c0_40, %c0_41] : memref<1x8xf32, #tpu.memory_space<vmem>>, vector<1x8xf32>
    %c0_42 = arith.constant 0 : index
    %c0_43 = arith.constant 0 : index
    %104 = vector.load %arg6[%c0_42, %c0_43] : memref<1x8xf32, #tpu.memory_space<vmem>>, vector<1x8xf32>
    %cst_44 = arith.constant dense<0.000000e+00> : vector<128xf32>
    %105 = vector.multi_reduction <add>, %102, %cst_44 [0] : vector<32x128xf32> to vector<128xf32>
    %106 = vector.shape_cast %105 : vector<128xf32> to vector<1x128xf32>
    %107 = arith.mulf %102, %102 : vector<32x128xf32>
    %cst_45 = arith.constant dense<0.000000e+00> : vector<128xf32>
    %108 = vector.multi_reduction <add>, %107, %cst_45 [0] : vector<32x128xf32> to vector<128xf32>
    %109 = vector.shape_cast %108 : vector<128xf32> to vector<1x128xf32>
    %110 = tpu.concatenate %106, %109 in 0 : vector<1x128xf32>, vector<1x128xf32> -> vector<2x128xf32>
    %cst_46 = arith.constant dense<0.000000e+00> : vector<2x8xf32>
    %111 = tpu.matmul %110, %20, %cst_46 {dimension_numbers = #tpu.dot_dimension_numbers<[1], [0], [0], [1], [0, 0, 1, 1], [], []>} : vector<2x128xf32>, vector<128x8xf32>, vector<2x8xf32> -> vector<2x8xf32>
    %112 = vector.extract_strided_slice %111 {offsets = [0, 0], sizes = [1, 8], strides = [1, 1]} : vector<2x8xf32> to vector<1x8xf32>
    %cst_47 = arith.constant 0.001953125 : f32
    %113 = vector.broadcast %cst_47 : f32 to vector<1x8xf32>
    %114 = arith.mulf %112, %113 : vector<1x8xf32>
    %115 = vector.extract_strided_slice %111 {offsets = [1, 0], sizes = [1, 8], strides = [1, 1]} : vector<2x8xf32> to vector<1x8xf32>
    %cst_48 = arith.constant 0.001953125 : f32
    %116 = vector.broadcast %cst_48 : f32 to vector<1x8xf32>
    %117 = arith.mulf %115, %116 : vector<1x8xf32>
    %118 = arith.mulf %114, %114 : vector<1x8xf32>
    %119 = arith.subf %117, %118 : vector<1x8xf32>
    %cst_49 = arith.constant 9.99999974E-6 : f32
    %120 = vector.broadcast %cst_49 : f32 to vector<1x8xf32>
    %121 = arith.addf %119, %120 : vector<1x8xf32>
    %122 = math.rsqrt %121 : vector<1x8xf32>
    %123 = arith.mulf %103, %122 : vector<1x8xf32>
    %124 = arith.mulf %114, %123 : vector<1x8xf32>
    %125 = arith.subf %104, %124 : vector<1x8xf32>
    %126 = tpu.concatenate %123, %125 in 0 : vector<1x8xf32>, vector<1x8xf32> -> vector<2x8xf32>
    %cst_50 = arith.constant dense<0.000000e+00> : vector<2x128xf32>
    %127 = tpu.matmul %126, %41, %cst_50 {dimension_numbers = #tpu.dot_dimension_numbers<[1], [0], [0], [1], [0, 0, 1, 1], [], []>} : vector<2x8xf32>, vector<8x128xf32>, vector<2x128xf32> -> vector<2x128xf32>
    %128 = vector.extract_strided_slice %127 {offsets = [0, 0], sizes = [1, 128], strides = [1, 1]} : vector<2x128xf32> to vector<1x128xf32>
    %129 = vector.extract_strided_slice %127 {offsets = [1, 0], sizes = [1, 128], strides = [1, 1]} : vector<2x128xf32> to vector<1x128xf32>
    %130 = vector.extract_strided_slice %42 {offsets = [0, 1, 0], sizes = [2, 16, 128], strides = [1, 1, 1]} : vector<2x18x128xf32> to vector<2x16x128xf32>
    %131 = vector.shape_cast %130 : vector<2x16x128xf32> to vector<32x128xf32>
    %132 = vector.broadcast %128 : vector<1x128xf32> to vector<32x128xf32>
    %133 = arith.mulf %102, %132 : vector<32x128xf32>
    %134 = vector.broadcast %129 : vector<1x128xf32> to vector<32x128xf32>
    %135 = arith.addf %133, %134 : vector<32x128xf32>
    %136 = arith.addf %135, %131 : vector<32x128xf32>
    %cst_51 = arith.constant 0.000000e+00 : f32
    %137 = vector.broadcast %cst_51 : f32 to vector<32x128xf32>
    %138 = arith.maximumf %136, %137 : vector<32x128xf32>
    %139 = vector.shape_cast %138 : vector<32x128xf32> to vector<2x16x128xf32>
    %c0_52 = arith.constant 0 : index
    %c0_53 = arith.constant 0 : index
    %c0_54 = arith.constant 0 : index
    %140 = vector.load %arg7[%c0_52, %c0_53, %c0_54] : memref<2x16x128xf32, #tpu.memory_space<vmem>>, vector<2x16x128xf32>
    tpu.vector_store %arg7[%c0_52, %c0_53, %c0_54], %139 {strides = array<i32>} : memref<2x16x128xf32, #tpu.memory_space<vmem>>, vector<2x16x128xf32>,
    return
  }
}

</mosaic_0001>

<bundles_post_ra>
// kernel: tpu_custom_call.1
= control target key start
LH: loop header
LB: loop body
LE: loop exit
PB: predicated region body
PF: predicated region fallthrough
CT: control target
= control target key end

     0   :  { %12 = vsyncpa [#allocation4], 0  ;;  %s2638_s0 = inlined_call_operand.vmem [shape: f32[2,18,128], index: 0, kind: input, shape index: {}]   ;;  %s2639_s1 = inlined_call_operand.hbm [shape: bf16[384,128], index: 1, kind: input, shape index: {}]   ;;  %s2640_s2 = inlined_call_operand.hbm [shape: bf16[384,128], index: 2, kind: input, shape index: {}]   ;;  %s2641_s3 = inlined_call_operand.vmem [shape: f32[1,8], index: 3, kind: input, shape index: {}]   ;;  %s2642_s4 = inlined_call_operand.vmem [shape: f32[1,8], index: 4, kind: input, shape index: {}]   ;;  %s2643_s5 = inlined_call_operand.vmem [shape: f32[1,8], index: 5, kind: input, shape index: {}]   ;;  %s2644_s6 = inlined_call_operand.vmem [shape: f32[1,8], index: 6, kind: input, shape index: {}]   ;;  %s2645_s7 = inlined_call_operand.hbm [shape: f32[2,16,128], index: 7, kind: output, shape index: {}]  }
   0x1   :  { %13 = vsyncpa [#allocation7], 0 }
   0x2   :  { %14 = vsyncpa [#allocation5], 0  ;;  %s2134_s24 = smov [#allocation3]  }
   0x3   :  { %s22_s25 = sshll.u32 %s2134_s24, 4  ;;  %s23_s25 = int_to_ptr.vmem [resolvable:$true] %s22_s25 }
   0x4   :  { %s2076_s26 = scalar_lea.vmem %s23_s25, 3072  ;;  %p2081_p1 = scmp.lt.s32.totalorder %s23_s25, %s23_s25 }
   0x5   :  { %p2077_p0 = scmp.ne.s32.totalorder %s23_s25, %s2076_s26  ;;  %p2082_p2 = scmp.lt.s32.totalorder %s2076_s26, %s2076_s26 }
   0x7   :  { %p2083_p3 = por %p2082_p2, %p2081_p1 }
   0x9   :  { %p2084_p4 = pnand %p2083_p3, %p2077_p0 }
   0xb   :  { %2087 = shalt.err (!%p2084_p4)
}
   0xc   :  { %s2135_s27 = smov 64   ;;  %s2136_s28 = smov 4  }
   0xd   :  { %28 = dma.hbm_to_vmem [thread:$0]  %s2639_s1, 3072, %s23_s25, [#allocation4], %s2135_s27, %s2135_s27, %s2136_s28  }
   0xe   :  { %s2137_s8 = smov [#allocation6]  }
   0xf   :  { %s34_s9 = sshll.u32 %s2137_s8, 4  ;;  %s35_s9 = int_to_ptr.vmem [resolvable:$true] %s34_s9 }
  0x10   :  { %s2096_s10 = scalar_lea.vmem %s35_s9, 3072  ;;  %p2101_p6 = scmp.lt.s32.totalorder %s35_s9, %s35_s9 }
  0x11   :  { %p2097_p5 = scmp.ne.s32.totalorder %s35_s9, %s2096_s10  ;;  %p2102_p7 = scmp.lt.s32.totalorder %s2096_s10, %s2096_s10 }
  0x13   :  { %p2103_p8 = por %p2102_p7, %p2101_p6 }
  0x15   :  { %p2104_p9 = pnand %p2103_p8, %p2097_p5 }
  0x17   :  { %2107 = shalt.err (!%p2104_p9)
}
  0x18   :  { %40 = dma.hbm_to_vmem [thread:$0]  %s2640_s2, 3072, %s35_s9, [#allocation7], %s2135_s27, %s2135_s27, %s2136_s28  }
  0x19   :  { %2128 = dma.done.wait [#allocation4], 3072  }
  0x1a   :  { %2129 = vsyncadd [#allocation4], 4294964224 }
  0x1b   :  { %2130 = dma.done.wait [#allocation7], 3072  }
  0x1c   :  { %2131 = vsyncadd [#allocation7], 4294964224  ;;  %v2008_v0 = vld [vmem:[#allocation3 + $0x78] sm:$0xff]   ;;  %v2011_v3 = vld [vmem:[#allocation3 + $0x70] sm:$0xff]   ;;  %vm340_vm0 = vsmask.f32 7424  ;;  %v56_v54 = vlaneseq }
  0x1d   :  { %v2009_v1 = vld [vmem:[#allocation3 + $0xb8] sm:$0xff]   ;;  %1763 = vmatprep.subr.bf16.mxu0 %v2008_v0  ;;  %v2012_v4 = vld [vmem:[#allocation3 + $0xb0] sm:$0xff]   ;;  %v2014_v6 = vld [vmem:[#allocation3 + $0x68] sm:$0xff]   ;;  %vm2646_vm1 = vcmask 1046528   ;;  %v2138_v60 = vmov 0.0   ;;  %v2139_v0 = vmov 1.0  }
  0x1e   :  { %v2010_v2 = vld [vmem:[#allocation3 + $0x38] sm:$0xff]   ;;  %1877 = vmatprep.subr.bf16.mxu1 %v2009_v1  ;;  %v2013_v5 = vld [vmem:[#allocation3 + $0x30] sm:$0xff]   ;;  %v2015_v7 = vld [vmem:[#allocation3 + $0xa8] sm:$0xff]   ;;  %v2213_v55 = vshrl.u32 %v56_v54, 7  ;;  %v2216_v58 = vand.u32 127, %v56_v54  ;;  %vm2647_vm15 = vmmov 0  }
  0x1f   :  { %1764 = vmatpush3.bf16.msra.mxu0 %v2010_v2  ;;  %1878 = vmatpush3.bf16.msra.mxu1 %v2009_v1  ;;  %v2016_v8 = vld [vmem:[#allocation3 + $0x28] sm:$0xff]   ;;  %v2017_v9 = vld [vmem:[#allocation3 + $0x60] sm:$0xff]   ;;  %v2020_v12 = vld [vmem:[#allocation3 + $0x58] sm:$0xff]  }
  0x20   :  { %1765 = vmatprep.subr.bf16.mxu0 %v2011_v3  ;;  %1879 = vmatprep.subr.bf16.mxu1 %v2012_v4  ;;  %v2018_v10 = vld [vmem:[#allocation3 + $0xa0] sm:$0xff]   ;;  %v2021_v13 = vld [vmem:[#allocation3 + $0x98] sm:$0xff]   ;;  %v2023_v15 = vld [vmem:[#allocation3 + $0x50] sm:$0xff]   ;;  %v72_v56 = vadd.s32 120, %v2213_v55  ;;  %v71_v59 = vadd.s32 112, %v2213_v55  ;;  %v70_v63 = vadd.s32 104, %v2213_v55 }
  0x21   :  { %v2019_v11 = vld [vmem:[#allocation3 + $0x20] sm:$0xff]   ;;  %v2022_v14 = vld [vmem:[#allocation3 + $0x18] sm:$0xff]   ;;  %v2024_v16 = vld [vmem:[#allocation3 + $0x90] sm:$0xff]   ;;  %v69_v3 = vadd.s32 96, %v2213_v55 }
  0x22   :  { %v2025_v17 = vld [vmem:[#allocation3 + $0x10] sm:$0xff]   ;;  %v2026_v18 = vld [vmem:[#allocation3 + $0x48] sm:$0xff]   ;;  %v2029_v21 = vld [vmem:[#allocation3 + $0x40] sm:$0xff]   ;;  %v182_v57 = vand.u32 7, %v72_v56  ;;  %v175_v62 = vand.u32 7, %v71_v59  ;;  %v168_v2 = vand.u32 7, %v70_v63 }
  0x23   :  { %1766 = vmatpush3.bf16.msra.mxu0 %v2013_v5  ;;  %1880 = vmatpush3.bf16.msra.mxu1 %v2012_v4  ;;  %v2027_v19 = vld [vmem:[#allocation3 + $0x88] sm:$0xff]   ;;  %v2030_v22 = vld [vmem:[#allocation3 + $0x80] sm:$0xff]   ;;  %v331_v24 = vld [vmem:[%s2638_s0 + $0x8] sm:$0xff]  ;;  %v161_v5 = vand.u32 7, %v69_v3 }
  0x24   :  { %1767 = vmatprep.subr.bf16.mxu0 %v2014_v6  ;;  %1881 = vmatprep.subr.bf16.mxu1 %v2015_v7  ;;  %v2028_v20 = vld [vmem:[#allocation3 + $0x8] sm:$0xff]   ;;  %v332_v25 = vld [vmem:[%s2638_s0 + $0x10] sm:$0x3]  ;;  %v333_v28 = vld [vmem:[%s2638_s0 + $0x18] sm:$0xff]  ;;  %vm2221_vm2 = vcmp.eq.s32.totalorder %v182_v57, %v2216_v58  ;;  %vm2232_vm3 = vcmp.eq.s32.totalorder %v175_v62, %v2216_v58  ;;  %vm2242_vm4 = vcmp.eq.s32.totalorder %v168_v2, %v2216_v58  ;;  %v68_v6 = vadd.s32 88, %v2213_v55 }
  0x25   :  { %v330_v23 = vld [vmem:[%s2638_s0] sm:$0xff]  ;;  %v337_v27 = vpack.c.bf16 %v332_v25, %v332_v25  ;;  %v335_v30 = vld [vmem:[%s2638_s0 + $0x28] sm:$0x3]  ;;  %v2031_v37 = vld [vmem:[#allocation3] sm:$0xff]   ;;  %vm2252_vm5 = vcmp.eq.s32.totalorder %v161_v5, %v2216_v58  ;;  %v2677_v25 = vmov 0 }
  0x26   :  { %v336_v26 = vpack.c.bf16 %v331_v24, %v330_v23  ;;  %v334_v29 = vld [vmem:[%s2638_s0 + $0x20] sm:$0xff]  ;;  %v339_v32 = vpack.c.bf16 %v335_v30, %v335_v30  ;;  %v62_v24 = vadd.s32 40, %v2213_v55  ;;  %v60_v30 = vadd.s32 24, %v2213_v55 }
  0x27   :  { %1768 = vmatpush3.bf16.msra.mxu0 %v2016_v8  ;;  %1882 = vmatpush3.bf16.msra.mxu1 %v2015_v7  ;;  %v338_v31 = vpack.c.bf16 %v334_v29, %v333_v28  ;;  %v349_v35 = vshll.u32 %v337_v27, 16  ;;  %v373_v38 = vrot.slane %v337_v27, 1  ;;  %v154_v8 = vand.u32 7, %v68_v6 }
  0x28   :  { %1769 = vmatprep.subr.bf16.mxu0 %v2017_v9  ;;  %1883 = vmatprep.subr.bf16.mxu1 %v2018_v10  ;;  %v342_v33 = vshrl.u32 %v336_v26, 16  ;;  %v344_v34 = vshll.u32 %v336_v26, 16  ;;  %v372_v36 = vrot.slane %v336_v26, 1  ;;  %v376_v40 = vrot.slane %v339_v32, 1 }
  0x29   :  { %v375_v39 = vrot.slane %v338_v31, 1  ;;  %v351_v42 = vrot.slane %v349_v35, 1  ;;  %v354_v43 = vshrl.u32 %v338_v31, 16  ;;  %v356_v45 = vshll.u32 %v338_v31, 16 }
  0x2a   :  { %v346_v41 = vrot.slane %v344_v34, 1  ;;  %v374_v44 = vsel %vm2646_vm1, %v372_v36, %v373_v38  ;;  %v361_v46 = vshll.u32 %v339_v32, 16  ;;  %v67_v9 = vadd.s32 80, %v2213_v55 }
  0x2b   :  { %1770 = vmatpush3.bf16.msra.mxu0 %v2019_v11  ;;  %1884 = vmatpush3.bf16.msra.mxu1 %v2018_v10  ;;  %v377_v48 = vsel %vm2646_vm1, %v375_v39, %v376_v40  ;;  %v358_v49 = vrot.slane %v356_v45, 1  ;;  %vm2262_vm6 = vcmp.eq.s32.totalorder %v154_v8, %v2216_v58  ;;  %v61_v27 = vadd.s32 32, %v2213_v55 }
  0x2c   :  { %1771 = vmatprep.subr.bf16.mxu0 %v2020_v12  ;;  %1885 = vmatprep.subr.bf16.mxu1 %v2021_v13  ;;  %v347_v47 = vor.u32 %v346_v41, %v342_v33  ;;  %v363_v50 = vrot.slane %v361_v46, 1  ;;  %v147_v11 = vand.u32 7, %v67_v9  ;;  %v66_v12 = vadd.s32 72, %v2213_v55 }
  0x2d   :  { %1893 = vmatprep.mubr.bf16.mxu1 %v374_v44  ;;  %v359_v52 = vor.u32 %v358_v49, %v354_v43  ;;  %v2679_v28 = vmov 0  ;;  %v105_v29 = vand.u32 7, %v61_v27  ;;  %v98_v32 = vand.u32 7, %v60_v30 }
  0x2e   :  { %v352_v51 = vsel %vm340_vm0, %v347_v47, %v351_v42  ;;  %vm2272_vm7 = vcmp.eq.s32.totalorder %v147_v11, %v2216_v58  ;;  %v59_v33 = vadd.s32 16, %v2213_v55  ;;  %v58_v34 = vadd.s32 8, %v2213_v55 }
  0x2f   :  { %1772 = vmatpush3.bf16.msra.mxu0 %v2022_v14  ;;  %1886 = vmatpush3.bf16.msra.mxu1 %v2021_v13  ;;  %v364_v53 = vsel %vm340_vm0, %v359_v52, %v363_v50  ;;  %v140_v14 = vand.u32 7, %v66_v12  ;;  %vm2332_vm13 = vcmp.eq.s32.totalorder %v105_v29, %v2216_v58  ;;  %vm2343_vm14 = vcmp.eq.s32.totalorder %v98_v32, %v2216_v58 }
  0x30   :  { %1773 = vmatprep.subr.bf16.mxu0 %v2023_v15  ;;  %1887 = vmatprep.subr.bf16.mxu1 %v2024_v16  ;;  %v65_v15 = vadd.s32 64, %v2213_v55  ;;  %v2683_v35 = vmov 0  ;;  %v91_v36 = vand.u32 7, %v59_v33  ;;  %v84_v38 = vand.u32 7, %v58_v34 }
  0x31   :  { %604 = vmatprep.mubr.bf16.mxu0 %v352_v51  ;;  %vm2282_vm8 = vcmp.eq.s32.totalorder %v140_v14, %v2216_v58  ;;  %v2684_v35 = vsel %vm2343_vm14, 4294967295, %v2683_v35  ;;  %v2685_v39 = vmov 0  ;;  %v2687_v40 = vmov 0 }
  0x32   :  { %vm2357_vm0 = vcmp.eq.s32.totalorder %v91_v36, %v2216_v58  ;;  %vm2365_vm1 = vcmp.eq.s32.totalorder %v84_v38, %v2216_v58  ;;  %v2689_v41 = vmov 0  ;;  %v319_v38 = vand.u32 7, %v2216_v58 }
  0x33   :  { %1774 = vmatpush3.bf16.msra.mxu0 %v2025_v17  ;;  %1888 = vmatpush3.bf16.msra.mxu1 %v2024_v16  ;;  %v133_v17 = vand.u32 7, %v65_v15  ;;  %v2686_v39 = vsel %vm2357_vm0, 4294967295, %v2685_v39  ;;  %v2688_v40 = vsel %vm2365_vm1, 4294967295, %v2687_v40 }
  0x34   :  { %1775 = vmatprep.subr.bf16.mxu0 %v2026_v18  ;;  %1889 = vmatprep.subr.bf16.mxu1 %v2027_v19  ;;  %v64_v18 = vadd.s32 56, %v2213_v55 }
  0x35   :  { %vm2292_vm9 = vcmp.eq.s32.totalorder %v133_v17, %v2216_v58 }
  0x37   :  { %1776 = vmatpush3.bf16.msra.mxu0 %v2028_v20  ;;  %1890 = vmatpush3.bf16.msra.mxu1 %v2027_v19  ;;  %v126_v20 = vand.u32 7, %v64_v18 }
  0x38   :  { %1777 = vmatprep.subr.bf16.mxu0 %v2029_v21  ;;  %1891 = vmatprep.subr.bf16.mxu1 %v2030_v22  ;;  %v63_v21 = vadd.s32 48, %v2213_v55 }
  0x39   :  { %vm2302_vm10 = vcmp.eq.s32.totalorder %v126_v20, %v2216_v58 }
  0x3a   :  { %v119_v23 = vand.u32 7, %v63_v21 }
  0x3b   :  { %1778 = vmatpush3.bf16.msra.mxu0 %v2031_v37  ;;  %1892 = vmatpush3.bf16.msra.mxu1 %v2030_v22  ;;  %v2675_v22 = vmov 0  ;;  %v77_v37 = vand.u32 7, %v2213_v55 }
  0x3c   :  { %1897 = vmatprep.subr.mxu0 %v2138_v60  ;;  %1932 = vmatprep.subr.mxu1 %v2138_v60  ;;  %v2676_v22 = vsel %vm2302_vm10, 4294967295, %v2675_v22  ;;  %vm2312_vm11 = vcmp.eq.s32.totalorder %v119_v23, %v2216_v58 }
  0x3d   :  { %v2678_v25 = vsel %vm2312_vm11, 4294967295, %v2677_v25 }
  0x3e   :  { %605 = vmatmul.mubr.bf16.vlgmr.msra.gmra.mxu0 %v336_v26  ;;  %1894 = vmatmul.mubr.bf16.vlgmr.msra.gmra.mxu1 %v377_v48  ;;  %v112_v26 = vand.u32 7, %v62_v24 }
  0x3f   :  { %612 = vmatprep.mubr.bf16.mxu0 %v364_v53  ;;  %1898 = vmatpush3.msk.msra.mxu0 %vm2221_vm2, %v2139_v0 }
  0x40   :  { %1899 = vmatprep.subr.mxu0 %v2138_v60  ;;  %vm2322_vm12 = vcmp.eq.s32.totalorder %v112_v26, %v2216_v58  ;;  %1934 = vmatprep.mubr.msk.f32.mxu1 %vm2647_vm15, %v2138_v60 }
  0x41   :  { %1900 = vmatpush3.msk.msra.mxu0 %vm2232_vm3, %v2139_v0  ;;  %v2680_v28 = vsel %vm2322_vm12, 4294967295, %v2679_v28 }
  0x42   :  { %1901 = vmatprep.subr.mxu0 %v2138_v60 }
  0x43   :  { %1902 = vmatpush3.msk.msra.mxu0 %vm2242_vm4, %v2139_v0 }
  0x44   :  { %1903 = vmatprep.subr.mxu0 %v2138_v60 }
  0x45   :  { %1904 = vmatpush3.msk.msra.mxu0 %vm2252_vm5, %v2139_v0 }
  0x46   :  { %613 = vmatmul.mubr.bf16.gmra.mxu0 %v338_v31  ;;  %1905 = vmatprep.subr.mxu0 %v2138_v60  ;;  %v2681_v31 = vmov 0 }
  0x47   :  { %1906 = vmatpush3.msk.msra.mxu0 %vm2262_vm6, %v2139_v0  ;;  %v2682_v31 = vsel %vm2332_vm13, 4294967295, %v2681_v31  ;;  %1929 = vmatprep.mubr.msk.f32.mxu0 %vm2647_vm15, %v2138_v60  ;;  %vm2371_vm15 = vcmp.eq.s32.totalorder %v77_v37, %v2216_v58 }
  0x48   :  { %1907 = vmatprep.subr.mxu0 %v2138_v60  ;;  %v2690_v41 = vsel %vm2371_vm15, 4294967295, %v2689_v41 }
  0x49   :  { %1908 = vmatpush3.msk.msra.mxu0 %vm2272_vm7, %v2139_v0 }
  0x4a   :  { %1909 = vmatprep.subr.mxu0 %v2138_v60 }
  0x4b   :  { %1910 = vmatpush3.msk.msra.mxu0 %vm2282_vm8, %v2139_v0 }
  0x4c   :  { %1911 = vmatprep.subr.mxu0 %v2138_v60 }
  0x4d   :  { %1912 = vmatpush3.msk.msra.mxu0 %vm2292_vm9, %v2139_v0 }
  0x4e   :  { %1913 = vmatprep.subr.mxu0 %v2138_v60 }
  0x4f   :  { %1914 = vmatpush3.msk.msra.mxu0 %vm2302_vm10, %v2139_v0 }
  0x50   :  { %1915 = vmatprep.subr.mxu0 %v2138_v60 }
  0x51   :  { %1916 = vmatpush3.msk.msra.mxu0 %vm2312_vm11, %v2139_v0 }
  0x52   :  { %1917 = vmatprep.subr.mxu0 %v2138_v60 }
  0x53   :  { %1918 = vmatpush3.msk.msra.mxu0 %vm2322_vm12, %v2139_v0 }
  0x54   :  { %1919 = vmatprep.subr.mxu0 %v2138_v60 }
  0x55   :  { %1920 = vmatpush3.msk.msra.mxu0 %vm2332_vm13, %v2139_v0  ;;  %vm951_vm13 = vsmask.f32 7938 }
  0x56   :  { %1921 = vmatprep.subr.mxu0 %v2138_v60 }
  0x57   :  { %1922 = vmatpush3.msk.msra.mxu0 %vm2343_vm14, %v2139_v0  ;;  %vm950_vm14 = vcmask 1043456  }
  0x58   :  { %1923 = vmatprep.subr.mxu0 %v2138_v60  ;;  %vm2445_vm11 = vmand %vm950_vm14, %vm951_vm13 }
  0x59   :  { %1924 = vmatpush3.msk.msra.mxu0 %vm2357_vm0, %v2139_v0  ;;  %vm2693_vm0 = vcmask 1040384  }
  0x5a   :  { %1925 = vmatprep.subr.mxu0 %v2138_v60 }
  0x5b   :  { %1926 = vmatpush3.msk.msra.mxu0 %vm2365_vm1, %v2139_v0  ;;  %vm2405_vm1 = vcmp.eq.s32.totalorder %v319_v38, %v2213_v55  ;;  %v2047_v38 = vld [vmem:[#allocation6 + $0x18] sm:$0xff]  }
  0x5c   :  { %1927 = vmatprep.subr.mxu0 %v2138_v60  ;;  %1933 = vmatpush3.msk.msra.mxu1 %vm2405_vm1, %v2139_v0 }
  0x5d   :  { %1928 = vmatpush3.msk.msra.mxu0 %vm2371_vm15, %v2139_v0  ;;  %vm2651_vm15 = vcmask 1040384  }
  0xfe   :  { %v1779_v42 = vpop.f32.mrf.mxu0  ;;  %v1895_v43 = vpop.f32.mrf.mxu1 }
 0x100   :  { %v1780_v44 = vpop.f32.mrf.mxu0  ;;  %v655_v45 = vpop.f32.mrf.mxu1 }
 0x101   :  { %v1781_v49 = vadd.f32 %v1780_v44, %v1779_v42 }
 0x102   :  { %v1782_v46 = vpop.f32.mrf.mxu0  ;;  %v1896_v47 = vpop.f32.mrf.mxu1 }
 0x103   :  { %v2384_v56 = vadd.f32 %v1781_v49, %v655_v45 }
 0x104   :  { %v1783_v48 = vpop.f32.mrf.mxu0  ;;  %v658_v51 = vpop.f32.mrf.mxu1 }
 0x105   :  { %v1784_v50 = vadd.f32 %v1783_v48, %v1782_v46  ;;  %v681_v3 = vmul.f32 %v2384_v56, %v2384_v56 }
 0x106   :  { %v1785_v52 = vpop.f32.mrf.mxu0 }
 0x107   :  { %v2382_v53 = vadd.f32 %v1784_v50, %v658_v51  ;;  %v2141_v50 = vmov 1966171168  }
 0x108   :  { %v1786_v54 = vpop.f32.mrf.mxu0  ;;  %v776_v51 = vunpack.c.l.s4 %v2141_v50  ;;  %v885_v50 = vsub.s32 1, %v2213_v55 }
 0x109   :  { %v1787_v57 = vadd.f32 %v1786_v54, %v1785_v52  ;;  %v682_v62 = vmul.f32 %v2382_v53, %v2382_v53  ;;  %v672_v5 = vadd.f32 %v2382_v53, %v2384_v56 }
 0x10a   :  { %v1788_v59 = vpop.f32.mrf.mxu0  ;;  %v777_v58 = vunpack.c.0.s8 %v776_v51 }
 0x10b   :  { %v2388_v63 = vadd.f32 %v1895_v43, %v1787_v57  ;;  %v685_v9 = vadd.f32 %v682_v62, %v681_v3  ;;  %v670_v62 = vld [vmem:[%s2641_s3] sm:$0x1] }
 0x10c   :  { %v1789_v2 = vpop.f32.mrf.mxu0  ;;  %v2413_v52 = vsub.s32 %v777_v58, %v2213_v55 }
 0x10d   :  { %v683_v6 = vmul.f32 %v2388_v63, %v2388_v63  ;;  %v1790_v8 = vadd.f32 %v1789_v2, %v1788_v59  ;;  %v673_v11 = vadd.f32 %v672_v5, %v2388_v63  ;;  %v671_v5 = vld [vmem:[%s2642_s4] sm:$0x1] }
 0x10f   :  { %v2397_v12 = vadd.f32 %v1896_v47, %v1790_v8  ;;  %v686_v14 = vadd.f32 %v685_v9, %v683_v6  ;;  %v2424_v8 = vsub.s32 0, %v2213_v55 }
 0x111   :  { %v674_v15 = vadd.f32 %v673_v11, %v2397_v12  ;;  %v684_v17 = vmul.f32 %v2397_v12, %v2397_v12 }
 0x113   :  { %v675_v18 = vrot.slane %v674_v15, 4  ;;  %v687_v20 = vadd.f32 %v686_v14, %v684_v17  ;;  %v2033_v17 = vld [vmem:[#allocation6 + $0xb0] sm:$0xff]  }
 0x115   :  { %v676_v21 = vadd.f32 %v675_v18, %v674_v15  ;;  %v688_v23 = vrot.slane %v687_v20, 4  ;;  %v2032_v15 = vld [vmem:[#allocation6 + $0xb8] sm:$0xff]  }
 0x116   :  { %1937 = vmatprep.subr.bf16.mxu0 %v2032_v15  ;;  %v2034_v18 = vld [vmem:[#allocation6 + $0x78] sm:$0xff]  }
 0x117   :  { %v677_v24 = vrot.slane %v676_v21, 2  ;;  %v689_v26 = vadd.f32 %v688_v23, %v687_v20  ;;  %v2035_v20 = vld [vmem:[#allocation6 + $0x38] sm:$0xff]   ;;  %1820 = vmatprep.subr.bf16.mxu1 %v2034_v18  ;;  %v2037_v23 = vld [vmem:[#allocation6 + $0x70] sm:$0xff]  }
 0x119   :  { %v678_v27 = vadd.f32 %v677_v24, %v676_v21  ;;  %v690_v29 = vrot.slane %v689_v26, 2  ;;  %v2036_v21 = vld [vmem:[#allocation6 + $0xa8] sm:$0xff]   ;;  %v2038_v24 = vld [vmem:[#allocation6 + $0x30] sm:$0xff]  }
 0x11b   :  { %v679_v30 = vrot.slane %v678_v27, 1  ;;  %v691_v32 = vadd.f32 %v690_v29, %v689_v26  ;;  %v2039_v26 = vld [vmem:[#allocation6 + $0xa0] sm:$0xff]   ;;  %v2041_v29 = vld [vmem:[#allocation6 + $0x28] sm:$0xff]  }
 0x11d   :  { %v692_v33 = vrot.slane %v691_v32, 1  ;;  %v680_v34 = vadd.f32 %v679_v30, %v678_v27  ;;  %v2040_v27 = vld [vmem:[#allocation6 + $0x68] sm:$0xff]   ;;  %v2042_v30 = vld [vmem:[#allocation6 + $0x98] sm:$0xff]  }
 0x11f   :  { %v693_v36 = vadd.f32 %v692_v33, %v691_v32  ;;  %v2043_v32 = vld [vmem:[#allocation6 + $0x60] sm:$0xff]  }
 0x120   :  { %v2044_v33 = vld [vmem:[#allocation6 + $0x20] sm:$0xff]  }
 0x121   :  { %v695_v37 = vsel %vm2651_vm15, %v680_v34, %v693_v36  ;;  %vm2653_vm15 = vcmask 64512   ;;  %v2045_v34 = vld [vmem:[#allocation6 + $0x90] sm:$0xff]   ;;  %v2046_v36 = vld [vmem:[#allocation6 + $0x58] sm:$0xff]  }
 0x122   :  { %1930 = vmatmul.mubr.f32.vlgmr.msra.gmra.mxu0 %v695_v37  ;;  %v2048_v37 = vld [vmem:[#allocation6 + $0x88] sm:$0xff]  }
 0x123   :  { %1938 = vmatpush3.bf16.msra.mxu0 %v2032_v15 }
 0x124   :  { %1939 = vmatprep.subr.bf16.mxu0 %v2033_v17 }
 0x127   :  { %1940 = vmatpush3.bf16.msra.mxu0 %v2033_v17 }
 0x128   :  { %1941 = vmatprep.subr.bf16.mxu0 %v2036_v21 }
 0x12b   :  { %1942 = vmatpush3.bf16.msra.mxu0 %v2036_v21 }
 0x12c   :  { %1943 = vmatprep.subr.bf16.mxu0 %v2039_v26 }
 0x12f   :  { %1944 = vmatpush3.bf16.msra.mxu0 %v2039_v26 }
 0x130   :  { %1945 = vmatprep.subr.bf16.mxu0 %v2042_v30 }
 0x133   :  { %1946 = vmatpush3.bf16.msra.mxu0 %v2042_v30 }
 0x134   :  { %1947 = vmatprep.subr.bf16.mxu0 %v2045_v34 }
 0x137   :  { %1948 = vmatpush3.bf16.msra.mxu0 %v2045_v34  ;;  %v953_v34 = vld [vmem:[#allocation2] sm:$0xf] }
 0x138   :  { %1949 = vmatprep.subr.bf16.mxu0 %v2048_v37 }
 0x13b   :  { %1950 = vmatpush3.bf16.msra.mxu0 %v2048_v37 }
 0x1e2   :  { %v762_v43 = vpop.f32.mrf.mxu0 }
 0x1e3   :  { %v766_v44 = vmul.f32 0.001953125, %v762_v43  ;;  %v2049_v43 = vld [vmem:[#allocation6 + $0x50] sm:$0xff]  }
 0x1e4   :  { %v1931_v45 = vpop.f32.mrf.mxu0 }
 0x1e5   :  { %v767_v46 = vmul.f32 %v766_v44, %v766_v44  ;;  %v2050_v45 = vld [vmem:[#allocation6 + $0x10] sm:$0xff]  }
 0x1e7   :  { %v769_v47 = vrot.slane %v767_v46, 7  ;;  %v2052_v46 = vld [vmem:[#allocation6 + $0x48] sm:$0xff]  }
 0x1e9   :  { %v771_v48 = vsub.f32 %v766_v44, %v769_v47  ;;  %v2053_v47 = vld [vmem:[#allocation6 + $0x8] sm:$0xff]  }
 0x1eb   :  { %v772_v49 = vadd.f32 1e-05, %v771_v48  ;;  %v2054_v48 = vld [vmem:[#allocation6 + $0x40] sm:$0xff]  }
 0x1ed   :  { %2058 = vrsqrt.f32 %v772_v49  ;;  %v2055_v49 = vld [vmem:[#allocation6] sm:$0xff]  }
 0x1fa   :  { %v2059_v54 = vpop.eup %2058 }
 0x1fb   :  { %v781_v57 = vrot.slane %v2059_v54, %v2413_v52 }
 0x1fd   :  { %v782_v59 = vcombine.high %v781_v57, %v781_v57 }
 0x1ff   :  { %v789_v2 = vrot.slane %v782_v59, %v2413_v52 }
 0x201   :  { %v791_v3 = vmul.f32 %v789_v2, %v670_v62 }
 0x203   :  { %v792_v6 = vmul.f32 %v791_v3, %v766_v44  ;;  %v2051_v44 = vld [vmem:[#allocation6 + $0x80] sm:$0xff]  }
 0x204   :  { %1951 = vmatprep.subr.bf16.mxu0 %v2051_v44 }
 0x205   :  { %v793_v9 = vsub.f32 %v671_v5, %v792_v6  ;;  %1952 = vmatpush3.bf16.msra.mxu0 %v2051_v44 }
 0x206   :  { %1992 = vmatprep.subr.mxu0 %v2138_v60 }
 0x207   :  { %v798_v11 = vrot.slane %v793_v9, %v2424_v8 }
 0x209   :  { %v800_v14 = vsel %vm2693_vm0, %v791_v3, %v798_v11  ;;  %vm907_vm0 = vsmask.f32 256 }
 0x20a   :  { %1935 = vmatmul.mubr.msk.f32.vlgmr.msra.gmra.mxu1 %vm2653_vm15, %v800_v14  ;;  %vm908_vm15 = vsmask.f32 4368 }
 0x20b   :  { %1821 = vmatpush3.bf16.msra.mxu1 %v2035_v20  ;;  %vm2440_vm12 = vmor %vm907_vm0, %vm908_vm15  ;;  %vm2698_vm15 = vcmask 1040384  }
 0x20c   :  { %1822 = vmatprep.subr.bf16.mxu1 %v2037_v23  ;;  %vm2451_vm10 = vmand %vm2698_vm15, %vm907_vm0 }
 0x20d   :  { %vm2701_vm14 = vmmov %vm2698_vm15  ;;  %vm989_vm15 = vsmask.f32 7440 }
 0x20e   :  { %vm975_vm0 = vmand %vm2701_vm14, %vm951_vm13 }
 0x20f   :  { %1823 = vmatpush3.bf16.msra.mxu1 %v2038_v24 }
 0x210   :  { %1824 = vmatprep.subr.bf16.mxu1 %v2040_v27 }
 0x213   :  { %1825 = vmatpush3.bf16.msra.mxu1 %v2041_v29 }
 0x214   :  { %1826 = vmatprep.subr.bf16.mxu1 %v2043_v32 }
 0x217   :  { %1827 = vmatpush3.bf16.msra.mxu1 %v2044_v33 }
 0x218   :  { %1828 = vmatprep.subr.bf16.mxu1 %v2046_v36 }
 0x21b   :  { %1829 = vmatpush3.bf16.msra.mxu1 %v2047_v38 }
 0x21c   :  { %1830 = vmatprep.subr.bf16.mxu1 %v2049_v43 }
 0x21f   :  { %1831 = vmatpush3.bf16.msra.mxu1 %v2050_v45  ;;  %v959_v45 = vld [vmem:[#allocation2 + $0x8] sm:$0x1] }
 0x220   :  { %1832 = vmatprep.subr.bf16.mxu1 %v2052_v46 }
 0x223   :  { %1833 = vmatpush3.bf16.msra.mxu1 %v2053_v47 }
 0x224   :  { %1834 = vmatprep.subr.bf16.mxu1 %v2054_v48 }
 0x227   :  { %1835 = vmatpush3.bf16.msra.mxu1 %v2055_v49 }
 0x228   :  { %1957 = vmatprep.subr.mxu1 %v2138_v60 }
 0x2ca   :  { %v871_v51 = vpop.f32.mrf.mxu1 }
 0x2cb   :  { %v878_v58 = vrot.slane %v871_v51, %v2424_v8  ;;  %v886_v54 = vrot.slane %v871_v51, %v885_v50  ;;  %v962_v51 = vld [vmem:[#allocation2 + $0xc] sm:$0xf] }
 0x2cc   :  { %v1936_v57 = vpop.f32.mrf.mxu1 }
 0x2cd   :  { %v879_v59 = vmul.f32 %v878_v58, %v2384_v56  ;;  %v880_v62 = vmul.f32 %v878_v58, %v2382_v53  ;;  %v881_v2 = vmul.f32 %v878_v58, %v2388_v63  ;;  %v882_v3 = vmul.f32 %v878_v58, %v2397_v12  ;;  %v966_v58 = vld [vmem:[#allocation2 + $0x14] sm:$0x1] }
 0x2cf   :  { %v887_v5 = vadd.f32 %v886_v54, %v879_v59  ;;  %v888_v6 = vadd.f32 %v886_v54, %v880_v62  ;;  %v889_v9 = vadd.f32 %v886_v54, %v881_v2  ;;  %v890_v11 = vadd.f32 %v886_v54, %v882_v3 }
 0x2d1   :  { %v891_v14 = vmax.f32 %v887_v5, 0.0  ;;  %v892_v15 = vmax.f32 %v888_v6, 0.0  ;;  %v893_v17 = vmax.f32 %v889_v9, 0.0  ;;  %v894_v18 = vmax.f32 %v890_v11, 0.0 }
 0x2d3   :  { %v1759_v20 = vpack.c.bf16 %v891_v14, %v891_v14  ;;  %v1760_v21 = vpack.c.bf16 %v892_v15, %v892_v15  ;;  %v1761_v23 = vpack.c.bf16 %v893_v17, %v893_v17  ;;  %v1762_v56 = vpack.c.bf16 %v894_v18, %v894_v18 }
 0x2d5   :  { %v911_v53 = vshrl.u32 %v1759_v20, 16  ;;  %v919_v63 = vshrl.u32 %v1760_v21, 16  ;;  %v928_v24 = vshrl.u32 %v1761_v23, 16  ;;  %v936_v26 = vshrl.u32 %v1762_v56, 16 }
 0x2d6   :  { %v914_v29 = vshll.u32 %v1759_v20, 16  ;;  %v922_v32 = vshll.u32 %v1760_v21, 16  ;;  %v931_v37 = vshll.u32 %v1761_v23, 16  ;;  %v939_v43 = vshll.u32 %v1762_v56, 16 }
 0x2d7   :  { %v913_v27 = vrot.slane %v911_v53, 7  ;;  %v921_v30 = vrot.slane %v919_v63, 7  ;;  %v930_v36 = vrot.slane %v928_v24, 7  ;;  %v938_v38 = vrot.slane %v936_v26, 7 }
 0x2d9   :  { %v916_v46 = vor.u32 %v914_v29, %v913_v27  ;;  %v917_v47 = vrot.slane %v913_v27, 4  ;;  %v924_v48 = vor.u32 %v922_v32, %v921_v30  ;;  %v926_v49 = vrot.slane %v921_v30, 4 }
 0x2da   :  { %v933_v54 = vor.u32 %v931_v37, %v930_v36  ;;  %v934_v57 = vrot.slane %v930_v36, 4  ;;  %v941_v59 = vor.u32 %v939_v43, %v938_v38  ;;  %v943_v62 = vrot.slane %v938_v38, 4 }
 0x2db   :  { %v925_v2 = vsel %vm2440_vm12, %v917_v47, %v924_v48  ;;  %v954_v3 = vsel %vm2445_vm11, %v916_v46, %v953_v34  ;;  %v960_v5 = vsel %vm2451_vm10, %v926_v49, %v959_v45 }
 0x2dc   :  { %v942_v6 = vsel %vm2440_vm12, %v934_v57, %v941_v59  ;;  %955 = vst [vmem:[#allocation2] sm:$0xf] %v954_v3  ;;  %956 = vst [vmem:[#allocation2 + $0x4] sm:$0xf] %v925_v2  ;;  %v963_v9 = vsel %vm2445_vm11, %v933_v54, %v962_v51  ;;  %v967_v11 = vsel %vm2451_vm10, %v943_v62, %v966_v58  ;;  %vm1045_vm11 = vcmask 1042432  }
 0x2dd   :  { %961 = vst [vmem:[#allocation2 + $0x8] sm:$0x1] %v960_v5  ;;  %964 = vst [vmem:[#allocation2 + $0xc] sm:$0xf] %v963_v9  ;;  %vm988_vm12 = vsmask.f32 3328 }
 0x2de   :  { %965 = vst [vmem:[#allocation2 + $0x10] sm:$0xf] %v942_v6  ;;  %968 = vst [vmem:[#allocation2 + $0x14] sm:$0x1] %v967_v11 }
 0x2df   :  { %vm2496_vm14 = vmor %vm988_vm12, %vm989_vm15  ;;  %vm2718_vm12 = vcmask 1046528  }
 0x2e0   :  { %vm2720_vm15 = vmmov %vm2718_vm12 }
 0x2e3   :  { %v969_v14 = vld [vmem:[#allocation2] sm:$0x1]  ;;  %v2469_v17 = vld [vmem:[#allocation2 + $0x4] sm:$0xf] }
 0x2e4   :  { %v976_v15 = vld [vmem:[#allocation2 + $0x8] sm:$0x1]  ;;  %v970_v18 = vsel %vm2451_vm10, 0, %v969_v14  ;;  %v972_v20 = vld [vmem:[#allocation2 + $0xc] sm:$0x1]  ;;  %v1050_v12 = vrot.slane %v2469_v17, 5 }
 0x2e5   :  { %v977_v21 = vsel %vm975_vm0, 0, %v976_v15  ;;  %v979_v23 = vld [vmem:[#allocation2 + $0x14] sm:$0x1]  ;;  %971 = vst [vmem:[#allocation2] sm:$0x1] %v970_v18  ;;  %v973_v56 = vsel %vm2451_vm10, 0, %v972_v20 }
 0x2e6   :  { %978 = vst [vmem:[#allocation2 + $0x8] sm:$0x1] %v977_v21  ;;  %v980_v53 = vsel %vm975_vm0, 0, %v979_v23  ;;  %v2475_v63 = vld [vmem:[#allocation2 + $0x10] sm:$0xf]  ;;  %v1001_v26 = vshll.u32 %v2469_v17, 16 }
 0x2e7   :  { %974 = vst [vmem:[#allocation2 + $0xc] sm:$0x1] %v973_v56  ;;  %981 = vst [vmem:[#allocation2 + $0x14] sm:$0x1] %v980_v53  ;;  %v1057_v24 = vrot.slane %v2475_v63, 5  ;;  %v1005_v27 = vshrl.u32 %v2469_v17, 16 }
 0x2e8   :  { %v1025_v29 = vshll.u32 %v2475_v63, 16  ;;  %v1029_v30 = vshrl.u32 %v2475_v63, 16  ;;  %vm1046_vm10 = vcmask 1046532   ;;  %v1052_v32 = vrot.slane %v1050_v12, 4 }
 0x2e9   :  { %v1059_v33 = vrot.slane %v1057_v24, 4  ;;  %v1003_v34 = vrot.slane %v1001_v26, 5  ;;  %v1007_v36 = vrot.slane %v1005_v27, 4  ;;  %vm2483_vm13 = vmor %vm1045_vm11, %vm1046_vm10  ;;  %vm2706_vm0 = vmmov 0  }
 0x2ea   :  { %v1027_v44 = vrot.slane %v1025_v29, 5  ;;  %v1031_v45 = vrot.slane %v1029_v30, 4  ;;  %vm2717_vm10 = vcmask 64512  }
 0x2eb   :  { %v1008_v18 = vor.u32 %v1007_v36, %v1003_v34 }
 0x2ec   :  { %v982_v37 = vld [vmem:[#allocation2] sm:$0xf]  ;;  %v1032_v26 = vor.u32 %v1031_v45, %v1027_v44 }
 0x2ed   :  { %v984_v38 = vld [vmem:[#allocation2 + $0x8] sm:$0x1]  ;;  %v1709_v46 = vrot.slane %v982_v37, 9  ;;  %v992_v54 = vshrl.u32 %v982_v37, 16  ;;  %v995_v57 = vshll.u32 %v982_v37, 16  ;;  %v1009_v29 = vrot.slane %v1008_v18, 4 }
 0x2ee   :  { %v1053_v47 = vrot.slane %v984_v38, 5  ;;  %v985_v48 = vld [vmem:[#allocation2 + $0xc] sm:$0xf]  ;;  %v987_v49 = vld [vmem:[#allocation2 + $0x14] sm:$0x1]  ;;  %v1011_v2 = vshll.u32 %v984_v38, 16 }
 0x2ef   :  { %v1710_v51 = vrot.slane %v985_v48, 9  ;;  %v1060_v58 = vrot.slane %v987_v49, 5  ;;  %v1051_v59 = vsel %vm2483_vm13, %v1709_v46, %v1050_v12  ;;  %v1016_v3 = vshrl.u32 %v985_v48, 16 }
 0x2f0   :  { %v1054_v62 = vsel %vm2483_vm13, %v1052_v32, %v1053_v47  ;;  %v994_v11 = vrot.slane %v992_v54, 4  ;;  %v997_v15 = vrot.slane %v995_v57, 5  ;;  %v1019_v21 = vshll.u32 %v985_v48, 16 }
 0x2f1   :  { %v1715_v5 = vcombine.low %v1051_v59, %v1054_v62  ;;  %v1058_v6 = vsel %vm2483_vm13, %v1710_v51, %v1057_v24  ;;  %v1061_v9 = vsel %vm2483_vm13, %v1059_v33, %v1060_v58  ;;  %v1018_v20 = vrot.slane %v1016_v3, 4  ;;  %vm2719_vm13 = vmmov %vm2718_vm12 }
 0x2f2   :  { %v1716_v14 = vcombine.low %v1058_v6, %v1061_v9  ;;  %v1035_v23 = vshll.u32 %v987_v49, 16  ;;  %v998_v56 = vor.u32 %v997_v15, %v994_v11  ;;  %v1013_v53 = vrot.slane %v1011_v2, 5 }
 0x2f3   :  { %1953 = vmatprep.mubr.bf16.mxu0 %v1715_v5  ;;  %v1021_v24 = vrot.slane %v1019_v21, 5  ;;  %v1033_v45 = vrot.slane %v1032_v26, 4  ;;  %v1711_v46 = vcombine.low %v982_v37, %v2469_v17  ;;  %v1712_v17 = vcombine.low %v985_v48, %v2475_v63 }
 0x2f4   :  { %1954 = vmatmul.mubr.bf16.vlgmr.msra.gmra.mxu0 %v1716_v14  ;;  %v999_v27 = vrot.slane %v998_v56, 4  ;;  %v1037_v32 = vrot.slane %v1035_v23, 5  ;;  %v1014_v36 = vsel %vm2496_vm14, %v1009_v29, %v1013_v53 }
 0x2f5   :  { %1993 = vmatpush3.msk.msra.mxu0 %vm2405_vm1, %v2139_v0  ;;  %1994 = vmatprep.mubr.msk.f32.mxu0 %vm2706_vm0, %v2138_v60  ;;  %v1022_v30 = vor.u32 %v1021_v24, %v1018_v20  ;;  %vm2707_vm1 = vnez %v2676_v22 }
 0x2f6   :  { %v1004_v33 = vsel %vm2496_vm14, %v999_v27, %v1003_v34  ;;  %v1038_v47 = vsel %vm2496_vm14, %v1033_v45, %v1037_v32 }
 0x2f7   :  { %v1713_v38 = vcombine.low %v1004_v33, %v1014_v36  ;;  %v1023_v43 = vrot.slane %v1022_v30, 4 }
 0x2f9   :  { %1310 = vmatprep.mubr.bf16.mxu1 %v1713_v38  ;;  %v1028_v42 = vsel %vm2496_vm14, %v1023_v43, %v1027_v44  ;;  %v1376_v43 = vld [vmem:[%s2643_s5] sm:$0x1]  ;;  %vm2721_vm14 = vmmov %vm2718_vm12 }
 0x2fa   :  { %1311 = vmatmul.mubr.bf16.vlgmr.msra.gmra.mxu1 %v1711_v46  ;;  %v1714_v49 = vcombine.low %v1028_v42, %v1038_v47  ;;  %v1377_v42 = vld [vmem:[%s2644_s6] sm:$0x1] }
 0x2fb   :  { %1958 = vmatpush3.msk.msra.mxu1 %vm2221_vm2, %v2139_v0  ;;  %vm2708_vm2 = vnez %v2678_v25 }
 0x2fc   :  { %1318 = vmatprep.mubr.bf16.mxu1 %v1714_v49  ;;  %1959 = vmatprep.subr.mxu1 %v2138_v60 }
 0x2fd   :  { %1960 = vmatpush3.msk.msra.mxu1 %vm2232_vm3, %v2139_v0  ;;  %vm2709_vm3 = vnez %v2680_v28 }
 0x2fe   :  { %1961 = vmatprep.subr.mxu1 %v2138_v60 }
 0x2ff   :  { %1962 = vmatpush3.msk.msra.mxu1 %vm2242_vm4, %v2139_v0  ;;  %vm2710_vm4 = vnez %v2682_v31 }
 0x300   :  { %1963 = vmatprep.subr.mxu1 %v2138_v60 }
 0x301   :  { %1964 = vmatpush3.msk.msra.mxu1 %vm2252_vm5, %v2139_v0  ;;  %vm2711_vm5 = vnez %v2684_v35 }
 0x302   :  { %1319 = vmatmul.mubr.bf16.gmra.mxu1 %v1712_v17  ;;  %1965 = vmatprep.subr.mxu1 %v2138_v60 }
 0x303   :  { %1966 = vmatpush3.msk.msra.mxu1 %vm2262_vm6, %v2139_v0  ;;  %1989 = vmatprep.mubr.msk.f32.mxu1 %vm2706_vm0, %v2138_v60  ;;  %vm2712_vm6 = vnez %v2686_v39 }
 0x304   :  { %1967 = vmatprep.subr.mxu1 %v2138_v60 }
 0x305   :  { %1968 = vmatpush3.msk.msra.mxu1 %vm2272_vm7, %v2139_v0  ;;  %vm2713_vm7 = vnez %v2688_v40 }
 0x306   :  { %1969 = vmatprep.subr.mxu1 %v2138_v60 }
 0x307   :  { %1970 = vmatpush3.msk.msra.mxu1 %vm2282_vm8, %v2139_v0  ;;  %vm2714_vm8 = vnez %v2690_v41 }
 0x308   :  { %1971 = vmatprep.subr.mxu1 %v2138_v60 }
 0x309   :  { %1972 = vmatpush3.msk.msra.mxu1 %vm2292_vm9, %v2139_v0  ;;  %vm2715_vm9 = vcmask 1040384  }
 0x30a   :  { %1973 = vmatprep.subr.mxu1 %v2138_v60  ;;  %vm2716_vm11 = vmmov %vm2715_vm9 }
 0x30b   :  { %1974 = vmatpush3.msk.msra.mxu1 %vm2707_vm1, %v2139_v0 }
 0x30c   :  { %1975 = vmatprep.subr.mxu1 %v2138_v60 }
 0x30d   :  { %1976 = vmatpush3.msk.msra.mxu1 %vm2708_vm2, %v2139_v0 }
 0x30e   :  { %1977 = vmatprep.subr.mxu1 %v2138_v60 }
 0x30f   :  { %1978 = vmatpush3.msk.msra.mxu1 %vm2709_vm3, %v2139_v0 }
 0x310   :  { %1979 = vmatprep.subr.mxu1 %v2138_v60 }
 0x311   :  { %1980 = vmatpush3.msk.msra.mxu1 %vm2710_vm4, %v2139_v0 }
 0x312   :  { %1981 = vmatprep.subr.mxu1 %v2138_v60 }
 0x313   :  { %1982 = vmatpush3.msk.msra.mxu1 %vm2711_vm5, %v2139_v0 }
 0x314   :  { %1983 = vmatprep.subr.mxu1 %v2138_v60 }
 0x315   :  { %1984 = vmatpush3.msk.msra.mxu1 %vm2712_vm6, %v2139_v0 }
 0x316   :  { %1985 = vmatprep.subr.mxu1 %v2138_v60 }
 0x317   :  { %1986 = vmatpush3.msk.msra.mxu1 %vm2713_vm7, %v2139_v0 }
 0x318   :  { %1987 = vmatprep.subr.mxu1 %v2138_v60 }
 0x319   :  { %1988 = vmatpush3.msk.msra.mxu1 %vm2714_vm8, %v2139_v0 }
 0x3b4   :  { %v1955_v61 = vpop.f32.mrf.mxu0 }
 0x3b6   :  { %v1361_v1 = vpop.f32.mrf.mxu0 }
 0x3b8   :  { %v1956_v10 = vpop.f32.mrf.mxu0 }
 0x3ba   :  { %v1836_v4 = vpop.f32.mrf.mxu1  ;;  %v1364_v25 = vpop.f32.mrf.mxu0 }
 0x3bc   :  { %v1837_v7 = vpop.f32.mrf.mxu1 }
 0x3bd   :  { %v1838_v19 = vadd.f32 %v1837_v7, %v1836_v4 }
 0x3be   :  { %v1839_v13 = vpop.f32.mrf.mxu1 }
 0x3bf   :  { %v2582_v39 = vadd.f32 %v1838_v19, %v1361_v1  ;;  %v2062_v1 = vld [vmem:[%s2638_s0] sm:$0xff] }
 0x3c0   :  { %v1840_v16 = vpop.f32.mrf.mxu1  ;;  %v1586_v4 = vrot.slane %v2062_v1, 1 }
 0x3c1   :  { %v1841_v22 = vadd.f32 %v1840_v16, %v1839_v13  ;;  %v1387_v34 = vmul.f32 %v2582_v39, %v2582_v39  ;;  %v2065_v16 = vld [vmem:[%s2638_s0 + $0x18] sm:$0xff] }
 0x3c2   :  { %v1842_v28 = vpop.f32.mrf.mxu1  ;;  %v1591_v19 = vrot.slane %v2065_v16, 1 }
 0x3c3   :  { %v2580_v31 = vadd.f32 %v1841_v22, %v1364_v25  ;;  %v2066_v22 = vld [vmem:[%s2638_s0 + $0x20] sm:$0xff] }
 0x3c4   :  { %v1843_v35 = vpop.f32.mrf.mxu1  ;;  %v1592_v25 = vrot.slane %v2066_v22, 1 }
 0x3c5   :  { %v1844_v60 = vadd.f32 %v1843_v35, %v1842_v28  ;;  %v1388_v0 = vmul.f32 %v2580_v31, %v2580_v31  ;;  %v1378_v37 = vadd.f32 %v2580_v31, %v2582_v39  ;;  %v2067_v28 = vld [vmem:[%s2638_s0 + $0x28] sm:$0x3] }
 0x3c6   :  { %v1845_v40 = vpop.f32.mrf.mxu1  ;;  %v1594_v35 = vrot.slane %v2067_v28, 1 }
 0x3c7   :  { %v2586_v41 = vadd.f32 %v1955_v61, %v1844_v60  ;;  %v1391_v51 = vadd.f32 %v1388_v0, %v1387_v34  ;;  %v1593_v0 = vsel %vm2720_vm15, %v1591_v19, %v1592_v25 }
 0x3c8   :  { %v1846_v63 = vpop.f32.mrf.mxu1 }
 0x3c9   :  { %v1389_v44 = vmul.f32 %v2586_v41, %v2586_v41  ;;  %v1847_v48 = vadd.f32 %v1846_v63, %v1845_v40  ;;  %v1379_v58 = vadd.f32 %v1378_v37, %v2586_v41  ;;  %v1595_v63 = vsel %vm2721_vm14, %v1592_v25, %v1594_v35 }
 0x3cb   :  { %v1373_v54 = vadd.f32 %v1956_v10, %v1847_v48  ;;  %v1392_v57 = vadd.f32 %v1391_v51, %v1389_v44  ;;  %v2064_v10 = vld [vmem:[%s2638_s0 + $0x10] sm:$0x3] }
 0x3cc   :  { %v1589_v13 = vrot.slane %v2064_v10, 1 }
 0x3cd   :  { %v1380_v59 = vadd.f32 %v1379_v58, %v1373_v54  ;;  %v1390_v62 = vmul.f32 %v1373_v54, %v1373_v54 }
 0x3cf   :  { %v1381_v2 = vrot.slane %v1380_v59, 4  ;;  %v1393_v3 = vadd.f32 %v1392_v57, %v1390_v62 }
 0x3d1   :  { %v1382_v5 = vadd.f32 %v1381_v2, %v1380_v59  ;;  %v1394_v6 = vrot.slane %v1393_v3, 4 }
 0x3d3   :  { %v1383_v9 = vrot.slane %v1382_v5, 2  ;;  %v1395_v11 = vadd.f32 %v1394_v6, %v1393_v3 }
 0x3d5   :  { %v1384_v14 = vadd.f32 %v1383_v9, %v1382_v5  ;;  %v1396_v15 = vrot.slane %v1395_v11, 2 }
 0x3d7   :  { %v1385_v18 = vrot.slane %v1384_v14, 1  ;;  %v1397_v20 = vadd.f32 %v1396_v15, %v1395_v11 }
 0x3d9   :  { %v1398_v21 = vrot.slane %v1397_v20, 1  ;;  %v1386_v23 = vadd.f32 %v1385_v18, %v1384_v14 }
 0x3db   :  { %v1399_v56 = vadd.f32 %v1398_v21, %v1397_v20 }
 0x3dd   :  { %v1400_v53 = vsel %vm2715_vm9, %v1386_v23, %v1399_v56 }
 0x3de   :  { %1990 = vmatmul.mubr.f32.vlgmr.msra.gmra.mxu1 %v1400_v53 }
 0x49e   :  { %v1467_v12 = vpop.f32.mrf.mxu1 }
 0x49f   :  { %v1471_v24 = vmul.f32 0.001953125, %v1467_v12 }
 0x4a0   :  { %v1991_v26 = vpop.f32.mrf.mxu1 }
 0x4a1   :  { %v1472_v27 = vmul.f32 %v1471_v24, %v1471_v24 }
 0x4a3   :  { %v1474_v29 = vrot.slane %v1472_v27, 7 }
 0x4a5   :  { %v1476_v30 = vsub.f32 %v1471_v24, %v1474_v29 }
 0x4a7   :  { %v1477_v32 = vadd.f32 1e-05, %v1476_v30 }
 0x4a9   :  { %2060 = vrsqrt.f32 %v1477_v32 }
 0x4b6   :  { %v2061_v33 = vpop.eup %2060 }
 0x4b7   :  { %v1486_v36 = vrot.slane %v2061_v33, %v2413_v52 }
 0x4b9   :  { %v1487_v38 = vcombine.high %v1486_v36, %v1486_v36 }
 0x4bb   :  { %v1494_v45 = vrot.slane %v1487_v38, %v2413_v52  ;;  %v2063_v52 = vld [vmem:[%s2638_s0 + $0x8] sm:$0xff]  ;;  %s2142_s0 = smov [#allocation8]  }
 0x4bc   :  { %v1587_v7 = vrot.slane %v2063_v52, 1  ;;  %s1633_s14 = sshll.u32 %s2142_s0, 4  ;;  %s1634_s14 = int_to_ptr.vmem [resolvable:$true] %s1633_s14 }
 0x4bd   :  { %v1496_v46 = vmul.f32 %v1494_v45, %v1376_v43  ;;  %s2108_s15 = scalar_lea.vmem %s1634_s14, 512  ;;  %p2113_p11 = scmp.lt.s32.totalorder %s1634_s14, %s1634_s14 }
 0x4be   :  { %v1588_v60 = vsel %vm2718_vm12, %v1586_v4, %v1587_v7  ;;  %v1590_v40 = vsel %vm2719_vm13, %v1587_v7, %v1589_v13  ;;  %p2109_p10 = scmp.ne.s32.totalorder %s1634_s14, %s2108_s15  ;;  %p2114_p12 = scmp.lt.s32.totalorder %s2108_s15, %s2108_s15 }
 0x4bf   :  { %v1497_v47 = vmul.f32 %v1496_v46, %v1471_v24 }
 0x4c0   :  { %p2115_p13 = por %p2114_p12, %p2113_p11 }
 0x4c1   :  { %v1498_v49 = vsub.f32 %v1377_v42, %v1497_v47 }
 0x4c2   :  { %p2116_p0 = pnand %p2115_p13, %p2109_p10 }
 0x4c3   :  { %v1503_v17 = vrot.slane %v1498_v49, %v2424_v8 }
 0x4c5   :  { %v1505_v61 = vsel %vm2716_vm11, %v1496_v46, %v1503_v17 }
 0x4c6   :  { %1995 = vmatmul.mubr.msk.f32.vlgmr.msra.gmra.mxu0 %vm2717_vm10, %v1505_v61 }
 0x586   :  { %v1575_v34 = vpop.f32.mrf.mxu0 }
 0x587   :  { %v1603_v37 = vrot.slane %v1575_v34, %v2424_v8  ;;  %v1611_v44 = vrot.slane %v1575_v34, %v885_v50 }
 0x588   :  { %v1996_v48 = vpop.f32.mrf.mxu0 }
 0x589   :  { %v1604_v51 = vmul.f32 %v1603_v37, %v2582_v39  ;;  %v1605_v58 = vmul.f32 %v1603_v37, %v2580_v31  ;;  %v1606_v57 = vmul.f32 %v1603_v37, %v2586_v41  ;;  %v1607_v59 = vmul.f32 %v1603_v37, %v1373_v54 }
 0x58b   :  { %v1612_v62 = vadd.f32 %v1611_v44, %v1604_v51  ;;  %v1613_v2 = vadd.f32 %v1611_v44, %v1605_v58  ;;  %v1614_v3 = vadd.f32 %v1611_v44, %v1606_v57  ;;  %v1615_v5 = vadd.f32 %v1611_v44, %v1607_v59 }
 0x58d   :  { %v1616_v6 = vadd.f32 %v1612_v62, %v1588_v60  ;;  %v1617_v9 = vadd.f32 %v1613_v2, %v1590_v40  ;;  %v1618_v8 = vadd.f32 %v1614_v3, %v1593_v0  ;;  %v1619_v11 = vadd.f32 %v1615_v5, %v1595_v63 }
 0x58f   :  { %v1620_v55 = vmax.f32 %v1616_v6, 0.0  ;;  %v1621_v50 = vmax.f32 %v1617_v9, 0.0  ;;  %v1622_v14 = vmax.f32 %v1618_v8, 0.0  ;;  %v1623_v15 = vmax.f32 %v1619_v11, 0.0 }
 0x591   :  { %1624 = vst [vmem:[#allocation8] sm:$0xff] %v1620_v55  ;;  %1625 = vst [vmem:[#allocation8 + $0x8] sm:$0xff] %v1621_v50 }
 0x592   :  { %1626 = vst [vmem:[#allocation8 + $0x10] sm:$0xff] %v1622_v14  ;;  %1627 = vst [vmem:[#allocation8 + $0x18] sm:$0xff] %v1623_v15 }
 0x593   :  { %2119 = shalt.err (!%p2116_p0)
}
 0x594   :  { %s2143_s16 = smov 128   ;;  %s2144_s17 = smov 8  }
 0x595   :  { %1639 = dma.vmem_to_hbm [thread:$0]  %s1634_s14, 512, %s2645_s7, [#allocation5], %s2143_s16, %s2143_s16, %s2144_s17  }
 0x596   :  { %2132 = dma.done.wait [#allocation5], 512  }
 0x597   :  { %2133 = vsyncadd [#allocation5], 4294966784 }
 0x598   :  { %1643 = vsyncpa [#allocation4], 1 }
 0x599   :  { %1644 = vsyncpa [#allocation7], 1 }
 0x59a   :  { %1645 = vsyncpa [#allocation5], 1 }

</bundles_post_ra>
